<compile_context>
chip_gen: v6e
topology: v6e:2x2x1
jax: 0.10.0
libtpu: 0.0.40
codegen_flags: <defaults>
</compile_context>

<pallas_src>
import functools

import jax
import jax.numpy as jnp
from jax.experimental import pallas as pl
from jax.experimental.pallas import tpu as pltpu


NEG_SLOPE = 0.01  # PyTorch nn.LeakyReLU default


def _round_up(x: int, m: int) -> int:
    return ((x + m - 1) // m) * m


def _mlp21_kernel(zi_ref, hi_ref, wz_ref, wh_ref, b_ref, o_ref):
    # Fused: (implicit concat) matmul + bias + LeakyReLU + row softmax.
    y = jnp.dot(zi_ref[...], wz_ref[...], preferred_element_type=jnp.float32)
    y = y + jnp.dot(hi_ref[...], wh_ref[...], preferred_element_type=jnp.float32)
    # Bias carries -1e30 in lane-padded columns (padded weight columns are 0),
    # so no explicit padding mask is needed before the softmax.
    y = y + b_ref[...]

    # LeakyReLU (negative_slope = 0.01)
    y = jnp.where(y > 0.0, y, NEG_SLOPE * y)

    # Numerically-stable softmax over the feature dim (dim=1).
    m = jnp.max(y, axis=-1, keepdims=True)
    e = jnp.exp(y - m)
    s = jnp.sum(e, axis=-1, keepdims=True)
    inv = 1.0 / s  # exact per-row reciprocal (out_pad x fewer EUP divides than e/s)

    # Store only the real columns; padded lanes never reach HBM.
    out_dim = o_ref.shape[-1]
    o_ref[...] = (e * inv)[:, :out_dim].astype(o_ref.dtype)


@functools.partial(jax.jit, static_argnames=("out_dim", "block_rows"))
def mlp21_forward(zi, hi, wz, wh, b2, *, out_dim: int, block_rows: int = 2048):
    """zi: (B, d_z), hi: (B, d_h); wz: (d_z, out_pad), wh: (d_h, out_pad),
    b2: (1, out_pad) with -1e30 in padded lanes.
    Returns softmax(leaky_relu(cat(zi, hi) @ W + b), axis=1) of shape (B, out_dim)."""
    B, d_z = zi.shape
    _, d_h = hi.shape
    out_pad = wz.shape[1]

    # Batch tile: large (amortize per-step overhead), multiple of 8 sublanes, and
    # >=2 balanced grid steps when B > 8 so v7x's two TensorCores both get work.
    if B <= 8:
        tm = B
    else:
        target = min(block_rows, pl.cdiv(B, 2))
        tm = max(8, _round_up(target, 8))
    grid = (pl.cdiv(B, tm),)

    # VMEM budget: double-buffered activation/output tiles + resident weight panels.
    itemsize = 4
    vmem_est = (2 * tm * (d_z + d_h + out_dim) + 2 * (d_z + d_h + 1) * out_pad) * itemsize
    vmem_limit = min(64 * 1024 * 1024, max(2 * vmem_est, 32 * 1024 * 1024))

    return pl.pallas_call(
        _mlp21_kernel,
        out_shape=jax.ShapeDtypeStruct((B, out_dim), zi.dtype),
        grid=grid,
        in_specs=[
            pl.BlockSpec((tm, d_z), lambda i: (i, 0)),        # Zi tile
            pl.BlockSpec((tm, d_h), lambda i: (i, 0)),        # Hi tile
            pl.BlockSpec((d_z, out_pad), lambda i: (0, 0)),   # Wz (VMEM-resident)
            pl.BlockSpec((d_h, out_pad), lambda i: (0, 0)),   # Wh (VMEM-resident)
            pl.BlockSpec((1, out_pad), lambda i: (0, 0)),     # bias (VMEM-resident)
        ],
        out_specs=pl.BlockSpec((tm, out_dim), lambda i: (i, 0)),
        compiler_params=pltpu.CompilerParams(
            dimension_semantics=("parallel",),                # batch tiles across TCs (v7x)
            vmem_limit_bytes=vmem_limit,
        ),
    )(zi, hi, wz, wh, b2)


def init_mlp21_params(key, d_z, d_h, output_dim, dtype=jnp.float32):
    """Mimics nn.Linear(input_dim, output_dim) init; weight stored as (in, out),
    split into Wz/Wh and lane-padded once at init. The softmax padding mask is
    folded into the bias (-1e30 in padded lanes)."""
    in_dim = d_z + d_h
    kw, kb = jax.random.split(key)
    bound = 1.0 / (in_dim ** 0.5)
    w = jax.random.uniform(kw, (in_dim, output_dim), dtype, -bound, bound)
    b = jax.random.uniform(kb, (output_dim,), dtype, -bound, bound)

    out_pad = _round_up(output_dim, 128)          # lane-dense MXU N dimension
    pad = out_pad - output_dim
    wz = jnp.pad(w[:d_z], ((0, 0), (0, pad)))     # padded columns stay exactly 0
    wh = jnp.pad(w[d_z:], ((0, 0), (0, pad)))
    b2 = jnp.pad(b, (0, pad), constant_values=-1e30).reshape(1, out_pad)
    return {"w": w, "b": b, "wz": wz, "wh": wh, "b2": b2, "out_dim": output_dim}


def _reference_forward(w, b, zi, hi):
    x = jnp.concatenate([zi, hi], axis=1)
    y = x @ w + b
    y = jnp.where(y > 0.0, y, NEG_SLOPE * y)
    return jax.nn.softmax(y, axis=1)


if __name__ == "__main__":
    d_z, d_h, output_dim = 32, 32, 16   # input_dim = 64
    batch = 8

    key = jax.random.PRNGKey(0)
    k_params, k_z, k_h = jax.random.split(key, 3)
    params = init_mlp21_params(k_params, d_z, d_h, output_dim)
    zi = jax.random.normal(k_z, (batch, d_z), dtype=jnp.float32)
    hi = jax.random.normal(k_h, (batch, d_h), dtype=jnp.float32)

    out = jax.block_until_ready(
        mlp21_forward(zi, hi, params["wz"], params["wh"], params["b2"],
                      out_dim=params["out_dim"])
    )
    ref = jax.block_until_ready(_reference_forward(params["w"], params["b"], zi, hi))

    assert out.shape == (batch, output_dim)
    assert jnp.allclose(out, ref, atol=1e-5, rtol=1e-5), "Pallas output mismatch vs reference"
    # rows of a softmax must sum to 1
    assert jnp.allclose(jnp.sum(out, axis=1), jnp.ones((batch,)), atol=1e-5)
    print("KERNEL_OK")
</pallas_src>

<mosaic_0001>
module attributes {stable_mosaic.version = 11 : i64} {
  func.func @_mlp21_kernel(%arg0: i32, %arg1: memref<8x32xf32, #tpu.memory_space<vmem>>, %arg2: memref<8x32xf32, #tpu.memory_space<vmem>>, %arg3: memref<32x128xf32, #tpu.memory_space<vmem>>, %arg4: memref<32x128xf32, #tpu.memory_space<vmem>>, %arg5: memref<1x128xf32, #tpu.memory_space<vmem>>, %arg6: memref<8x16xf32, #tpu.memory_space<vmem>>) attributes {dimension_semantics = [#tpu.dimension_semantics<parallel>], iteration_bounds = array<i64: 1>, scalar_prefetch = 0 : i64, scratch_operands = 0 : i64, tpu.core_type = #tpu.core_type<tc>, window_params = [{transform_indices = @transform_0, window_bounds = array<i64: 8, 32>}, {transform_indices = @transform_1, window_bounds = array<i64: 8, 32>}, {pipeline_mode = #tpu.pipeline_mode<synchronous>, transform_indices = @transform_2, window_bounds = array<i64: 32, 128>}, {pipeline_mode = #tpu.pipeline_mode<synchronous>, transform_indices = @transform_3, window_bounds = array<i64: 32, 128>}, {pipeline_mode = #tpu.pipeline_mode<synchronous>, transform_indices = @transform_4, window_bounds = array<i64: 1, 128>}, {transform_indices = @transform_5, window_bounds = array<i64: 8, 16>}]} {
    %c0 = arith.constant 0 : index
    %c0_0 = arith.constant 0 : index
    %0 = vector.load %arg1[%c0, %c0_0] : memref<8x32xf32, #tpu.memory_space<vmem>>, vector<8x32xf32>
    %c0_1 = arith.constant 0 : index
    %c0_2 = arith.constant 0 : index
    %1 = vector.load %arg3[%c0_1, %c0_2] : memref<32x128xf32, #tpu.memory_space<vmem>>, vector<32x128xf32>
    %cst = arith.constant dense<0.000000e+00> : vector<8x128xf32>
    %2 = tpu.matmul %0, %1, %cst {dimension_numbers = #tpu.dot_dimension_numbers<[1], [0], [0], [1], [0, 0, 1, 1], [], []>} : vector<8x32xf32>, vector<32x128xf32>, vector<8x128xf32> -> vector<8x128xf32>
    %c0_3 = arith.constant 0 : index
    %c0_4 = arith.constant 0 : index
    %3 = vector.load %arg2[%c0_3, %c0_4] : memref<8x32xf32, #tpu.memory_space<vmem>>, vector<8x32xf32>
    %c0_5 = arith.constant 0 : index
    %c0_6 = arith.constant 0 : index
    %4 = vector.load %arg4[%c0_5, %c0_6] : memref<32x128xf32, #tpu.memory_space<vmem>>, vector<32x128xf32>
    %cst_7 = arith.constant dense<0.000000e+00> : vector<8x128xf32>
    %5 = tpu.matmul %3, %4, %cst_7 {dimension_numbers = #tpu.dot_dimension_numbers<[1], [0], [0], [1], [0, 0, 1, 1], [], []>} : vector<8x32xf32>, vector<32x128xf32>, vector<8x128xf32> -> vector<8x128xf32>
    %6 = arith.addf %2, %5 : vector<8x128xf32>
    %c0_8 = arith.constant 0 : index
    %c0_9 = arith.constant 0 : index
    %7 = vector.load %arg5[%c0_8, %c0_9] : memref<1x128xf32, #tpu.memory_space<vmem>>, vector<1x128xf32>
    %8 = vector.broadcast %7 : vector<1x128xf32> to vector<8x128xf32>
    %9 = arith.addf %6, %8 : vector<8x128xf32>
    %cst_10 = arith.constant 0.000000e+00 : f32
    %10 = vector.broadcast %cst_10 : f32 to vector<8x128xf32>
    %11 = arith.cmpf ogt, %9, %10 : vector<8x128xf32>
    %cst_11 = arith.constant 0.00999999977 : f32
    %12 = vector.broadcast %cst_11 : f32 to vector<8x128xf32>
    %13 = arith.mulf %12, %9 : vector<8x128xf32>
    %14 = arith.select %11, %9, %13 : vector<8x128xi1>, vector<8x128xf32>
    %cst_12 = arith.constant dense<0xFF800000> : vector<8xf32>
    %15 = vector.multi_reduction <maximumf>, %14, %cst_12 [1] : vector<8x128xf32> to vector<8xf32>
    %16 = vector.shape_cast %15 : vector<8xf32> to vector<8x1xf32>
    %17 = vector.broadcast %16 : vector<8x1xf32> to vector<8x128xf32>
    %18 = arith.subf %14, %17 : vector<8x128xf32>
    %19 = math.exp %18 : vector<8x128xf32>
    %cst_13 = arith.constant dense<0.000000e+00> : vector<8xf32>
    %20 = vector.multi_reduction <add>, %19, %cst_13 [1] : vector<8x128xf32> to vector<8xf32>
    %21 = vector.shape_cast %20 : vector<8xf32> to vector<8x1xf32>
    %cst_14 = arith.constant 1.000000e+00 : f32
    %22 = vector.broadcast %cst_14 : f32 to vector<8x1xf32>
    %23 = arith.divf %22, %21 : vector<8x1xf32>
    %24 = vector.broadcast %23 : vector<8x1xf32> to vector<8x128xf32>
    %25 = arith.mulf %19, %24 : vector<8x128xf32>
    %26 = vector.extract_strided_slice %25 {offsets = [0, 0], sizes = [8, 16], strides = [1, 1]} : vector<8x128xf32> to vector<8x16xf32>
    %c0_15 = arith.constant 0 : index
    %c0_16 = arith.constant 0 : index
    %27 = vector.load %arg6[%c0_15, %c0_16] : memref<8x16xf32, #tpu.memory_space<vmem>>, vector<8x16xf32>
    tpu.vector_store %arg6[%c0_15, %c0_16], %26 {strides = array<i32>} : memref<8x16xf32, #tpu.memory_space<vmem>>, vector<8x16xf32>,
    return
  }
  func.func @transform_0(%arg0: i32) -> (i32, i32) {
    %c0_i32 = arith.constant 0 : i32
    %c0_i32_0 = arith.constant 0 : i32
    return %arg0, %c0_i32 : i32, i32
  }
  func.func @transform_1(%arg0: i32) -> (i32, i32) {
    %c0_i32 = arith.constant 0 : i32
    %c0_i32_0 = arith.constant 0 : i32
    return %arg0, %c0_i32 : i32, i32
  }
  func.func @transform_2(%arg0: i32) -> (i32, i32) {
    %c0_i32 = arith.constant 0 : i32
    %c0_i32_0 = arith.constant 0 : i32
    %c0_i32_1 = arith.constant 0 : i32
    return %c0_i32, %c0_i32_0 : i32, i32
  }
  func.func @transform_3(%arg0: i32) -> (i32, i32) {
    %c0_i32 = arith.constant 0 : i32
    %c0_i32_0 = arith.constant 0 : i32
    %c0_i32_1 = arith.constant 0 : i32
    return %c0_i32, %c0_i32_0 : i32, i32
  }
  func.func @transform_4(%arg0: i32) -> (i32, i32) {
    %c0_i32 = arith.constant 0 : i32
    %c0_i32_0 = arith.constant 0 : i32
    %c0_i32_1 = arith.constant 0 : i32
    return %c0_i32, %c0_i32_0 : i32, i32
  }
  func.func @transform_5(%arg0: i32) -> (i32, i32) {
    %c0_i32 = arith.constant 0 : i32
    %c0_i32_0 = arith.constant 0 : i32
    return %arg0, %c0_i32 : i32, i32
  }
}

</mosaic_0001>

<bundles_post_ra>
// kernel: mlp21_forward.1
= control target key start
LH: loop header
LB: loop body
LE: loop exit
PB: predicated region body
PF: predicated region fallthrough
CT: control target
= control target key end

     0   :  { %10 = vsyncpa [#allocation3], 0  ;;  %s482_s0 = inlined_call_operand.hbm [shape: f32[8,32], index: 0, kind: input, shape index: {}]   ;;  %s483_s1 = inlined_call_operand.hbm [shape: f32[8,32], index: 1, kind: input, shape index: {}]   ;;  %s484_s2 = inlined_call_operand.hbm [shape: f32[32,128], index: 2, kind: input, shape index: {}]   ;;  %s485_s3 = inlined_call_operand.hbm [shape: f32[32,128], index: 3, kind: input, shape index: {}]   ;;  %s486_s4 = inlined_call_operand.vmem [shape: f32[1,128], index: 4, kind: input, shape index: {}]   ;;  %s487_s5 = inlined_call_operand.hbm [shape: f32[8,16], index: 5, kind: output, shape index: {}]  }
   0x1   :  { %11 = vsyncpa [#allocation6], 0 }
   0x2   :  { %12 = vsyncpa [#allocation9], 0 }
   0x3   :  { %13 = vsyncpa [#allocation4], 0  ;;  %s425_s18 = smov [#allocation5]   ;;  %s426_s20 = smov [#allocation2]  }
   0x4   :  { %s30_s19 = sshll.u32 %s425_s18, 4  ;;  %s20_s21 = sshll.u32 %s426_s20, 4  ;;  %s31_s19 = int_to_ptr.vmem [resolvable:$true] %s30_s19  ;;  %s21_s21 = int_to_ptr.vmem [resolvable:$true] %s20_s21 }
   0x5   :  { %s325_s22 = scalar_lea.vmem %s31_s19, 128  ;;  %p330_p1 = scmp.lt.s32.totalorder %s31_s19, %s31_s19 }
   0x6   :  { %p326_p0 = scmp.ne.s32.totalorder %s31_s19, %s325_s22  ;;  %p331_p2 = scmp.lt.s32.totalorder %s325_s22, %s325_s22 }
   0x8   :  { %p332_p3 = por %p331_p2, %p330_p1 }
   0xa   :  { %p333_p4 = pnand %p332_p3, %p326_p0 }
   0xc   :  { %336 = shalt.err (!%p333_p4)
}
   0xd   :  { %33 = dma.hbm_to_vmem [thread:$0]  %s483_s1, 128, %s31_s19, [#allocation6]  }
   0xe   :  { %s345_s25 = scalar_lea.vmem %s21_s21, 128  ;;  %p350_p6 = scmp.lt.s32.totalorder %s21_s21, %s21_s21 }
   0xf   :  { %p346_p5 = scmp.ne.s32.totalorder %s21_s21, %s345_s25  ;;  %p351_p7 = scmp.lt.s32.totalorder %s345_s25, %s345_s25 }
  0x11   :  { %p352_p8 = por %p351_p7, %p350_p6 }
  0x13   :  { %p353_p9 = pnand %p352_p8, %p346_p5 }
  0x15   :  { %356 = shalt.err (!%p353_p9)
}
  0x16   :  { %23 = dma.hbm_to_vmem [thread:$0]  %s482_s0, 128, %s21_s21, [#allocation3]  }
  0x17   :  { %s427_s28 = smov [#allocation7]  }
  0x18   :  { %s39_s29 = sshll.u32 %s427_s28, 4  ;;  %s40_s29 = int_to_ptr.vmem [resolvable:$true] %s39_s29 }
  0x19   :  { %s365_s30 = scalar_lea.vmem %s40_s29, 512  ;;  %p370_p11 = scmp.lt.s32.totalorder %s40_s29, %s40_s29 }
  0x1a   :  { %p366_p10 = scmp.ne.s32.totalorder %s40_s29, %s365_s30  ;;  %p371_p12 = scmp.lt.s32.totalorder %s365_s30, %s365_s30 }
  0x1c   :  { %p372_p13 = por %p371_p12, %p370_p11 }
  0x1e   :  { %p373_p0 = pnand %p372_p13, %p366_p10 }
  0x20   :  { %376 = shalt.err (!%p373_p0)
}
  0x21   :  { %s428_s1 = smov 128   ;;  %s429_s6 = smov 8  }
  0x22   :  { %45 = dma.hbm_to_vmem [thread:$0]  %s484_s2, 512, %s40_s29, [#allocation6], %s428_s1, %s428_s1, %s429_s6  }
  0x23   :  { %s430_s9 = smov [#allocation8]  }
  0x24   :  { %s51_s10 = sshll.u32 %s430_s9, 4  ;;  %s52_s10 = int_to_ptr.vmem [resolvable:$true] %s51_s10 }
  0x25   :  { %s385_s0 = scalar_lea.vmem %s52_s10, 512  ;;  %p390_p2 = scmp.lt.s32.totalorder %s52_s10, %s52_s10 }
  0x26   :  { %p386_p1 = scmp.ne.s32.totalorder %s52_s10, %s385_s0  ;;  %p391_p3 = scmp.lt.s32.totalorder %s385_s0, %s385_s0 }
  0x28   :  { %p392_p4 = por %p391_p3, %p390_p2 }
  0x2a   :  { %p393_p5 = pnand %p392_p4, %p386_p1 }
  0x2c   :  { %396 = shalt.err (!%p393_p5)
}
  0x2d   :  { %57 = dma.hbm_to_vmem [thread:$0]  %s485_s3, 512, %s52_s10, [#allocation9], %s428_s1, %s428_s1, %s429_s6  }
  0x2e   :  { %417 = dma.done.wait [#allocation3], 128  }
  0x2f   :  { %418 = vsyncadd [#allocation3], 4294967168 }
  0x30   :  { %419 = dma.done.wait [#allocation6], 640  }
  0x31   :  { %420 = vsyncadd [#allocation6], 4294966656 }
  0x32   :  { %421 = dma.done.wait [#allocation9], 512  }
  0x33   :  { %422 = vsyncadd [#allocation9], 4294966784  ;;  %v431_v0 = vmov 0.0   ;;  %vm432_vm0 = vmmov 0   ;;  %v81_v1 = vld [vmem:[#allocation8 + $0x18] sm:$0xff]  ;;  %v80_v3 = vld [vmem:[#allocation8 + $0x10] sm:$0xff] }
  0x34   :  { %282 = vmatprep.subr.mxu0 %v431_v0  ;;  %293 = vmatprep.subr.mxu1 %v431_v0  ;;  %v76_v2 = vld [vmem:[#allocation7 + $0x18] sm:$0xff]  ;;  %v75_v4 = vld [vmem:[#allocation7 + $0x10] sm:$0xff]  ;;  %v79_v5 = vld [vmem:[#allocation8 + $0x8] sm:$0xff]  ;;  %vm82_vm1 = vcmask 261120   ;;  %s433_s13 = smov [#allocation10]   ;;  %vm250_vm3 = vcmask 130048  }
  0x35   :  { %290 = vmatprep.mubr.msk.f32.mxu0 %vm432_vm0, %v431_v0  ;;  %301 = vmatprep.mubr.msk.f32.mxu1 %vm432_vm0, %v431_v0  ;;  %v74_v6 = vld [vmem:[#allocation7 + $0x8] sm:$0xff]  ;;  %v78_v7 = vld [vmem:[#allocation8] sm:$0xff]  ;;  %v77_v9 = vld [vmem:[#allocation5] sm:$0xff]  ;;  %s258_s14 = sshll.u32 %s433_s13, 4  ;;  %s259_s14 = int_to_ptr.vmem [resolvable:$true] %s258_s14 }
  0x36   :  { %283 = vmatpush3.msra.mxu0 %v81_v1  ;;  %294 = vmatpush3.msra.mxu1 %v76_v2  ;;  %v73_v8 = vld [vmem:[#allocation7] sm:$0xff]  ;;  %v72_v10 = vld [vmem:[#allocation2] sm:$0xff]  ;;  %p402_p7 = scmp.lt.s32.totalorder %s259_s14, %s259_s14 }
  0x37   :  { %284 = vmatprep.subr.mxu0 %v431_v0  ;;  %295 = vmatprep.subr.mxu1 %v431_v0  ;;  %v271_v13 = vld [vmem:[%s486_s4] ss:$0 sm:$0xff]  ;;  %s397_s4 = scalar_lea.vmem %s259_s14, 128 }
  0x38   :  { %285 = vmatpush3.msra.mxu0 %v80_v3  ;;  %296 = vmatpush3.msra.mxu1 %v75_v4  ;;  %p398_p6 = scmp.ne.s32.totalorder %s259_s14, %s397_s4  ;;  %p403_p8 = scmp.lt.s32.totalorder %s397_s4, %s397_s4 }
  0x39   :  { %286 = vmatprep.subr.mxu0 %v431_v0  ;;  %297 = vmatprep.subr.mxu1 %v431_v0 }
  0x3a   :  { %287 = vmatpush3.msra.mxu0 %v79_v5  ;;  %298 = vmatpush3.msra.mxu1 %v74_v6  ;;  %p404_p9 = por %p403_p8, %p402_p7 }
  0x3b   :  { %288 = vmatprep.subr.mxu0 %v431_v0  ;;  %299 = vmatprep.subr.mxu1 %v431_v0 }
  0x3c   :  { %289 = vmatpush3.msra.mxu0 %v78_v7  ;;  %300 = vmatpush3.msra.mxu1 %v73_v8  ;;  %p405_p10 = pnand %p404_p9, %p398_p6 }
  0x3d   :  { %291 = vmatmul.mubr.msk.f32.vlgmr.msra.gmra.mxu0 %vm82_vm1, %v77_v9  ;;  %302 = vmatmul.mubr.msk.f32.vlgmr.msra.gmra.mxu1 %vm82_vm1, %v72_v10 }
  0xfd   :  { %v152_v11 = vpop.f32.mrf.mxu0  ;;  %v225_v12 = vpop.f32.mrf.mxu1 }
  0xfe   :  { %v226_v14 = vadd.f32 %v225_v12, %v152_v11 }
  0xff   :  { %v292_v15 = vpop.f32.mrf.mxu0  ;;  %v303_v16 = vpop.f32.mrf.mxu1 }
 0x100   :  { %v236_v17 = vadd.f32 %v271_v13, %v226_v14 }
 0x102   :  { %vm237_vm2 = vcmp.gt.f32.partialorder %v236_v17, 0.0  ;;  %v238_v18 = vmul.f32 0.01, %v236_v17 }
 0x104   :  { %v239_v19 = vsel %vm237_vm2, %v236_v17, %v238_v18 }
 0x105   :  { %240 = vmax.xlane.f32.xlu0 %v239_v19 }
 0x18e   :  { %v241_v20 = vpop.xlane.xlu0 %240 }
 0x18f   :  { %v242_v21 = vsub.f32 %v239_v19, %v241_v20 }
 0x191   :  { %v243_v22 = vmul.f32 1.442695, %v242_v21 }
 0x193   :  { %313 = vpow2.f32 %v243_v22 }
 0x1a0   :  { %v314_v23 = vpop.eup %313 }
 0x1a1   :  { %245 = vadd.xlane.f32.xlu0 %v314_v23 }
 0x22a   :  { %v246_v24 = vpop.xlane.xlu0 %245 }
 0x22b   :  { %315 = vrcp.f32 %v246_v24 }
 0x238   :  { %v316_v25 = vpop.eup %315 }
 0x239   :  { %v249_v26 = vmul.f32 %v316_v25, %v314_v23 }
 0x23b   :  { %251 = vst.msk [vmem:[#allocation10] sm:$0xff] %vm250_vm3, %v249_v26 }
 0x23c   :  { %408 = shalt.err (!%p405_p10)
}
 0x23d   :  { %261 = dma.vmem_to_hbm [thread:$0]  %s259_s14, 128, %s487_s5, [#allocation4]  }
 0x23e   :  { %423 = dma.done.wait [#allocation4], 128  }
 0x23f   :  { %424 = vsyncadd [#allocation4], 4294967168 }
 0x240   :  { %265 = vsyncpa [#allocation3], 1 }
 0x241   :  { %266 = vsyncpa [#allocation6], 1 }
 0x242   :  { %267 = vsyncpa [#allocation9], 1 }
 0x243   :  { %268 = vsyncpa [#allocation4], 1 }

</bundles_post_ra>
